<compile_context>
chip_gen: v6e
topology: v6e:2x2x1
jax: 0.10.0
libtpu: 0.0.40
codegen_flags: <defaults>
</compile_context>

<pallas_src>
import jax
import jax.numpy as jnp
from jax.experimental import pallas as pl
from jax.experimental.pallas import tpu as pltpu


def adain_kernel(gb_ref, x_ref, o_ref):
    # gb_ref : (TR, 2) f32  -- column 0 = gamma, column 1 = beta (per fused B*C row)
    # x_ref, o_ref : (TR, T)
    T = x_ref.shape[-1]
    inv_t = 1.0 / T

    x = x_ref[...].astype(jnp.float32)                    # (TR, T)

    # --- two-pass statistics over the time (lane) axis (numerically safe) ---
    u = jnp.sum(x, axis=-1, keepdims=True) * inv_t        # (TR, 1)
    xc = x - u                                            # centered
    var = jnp.sum(xc * xc, axis=-1, keepdims=True) * inv_t
    inv_std = jax.lax.rsqrt(var + 1e-8)                   # EUP slot, effectively free

    # --- fold (1+gamma)/std into a per-row FMA ---
    gamma = gb_ref[:, 0:1]                                 # (TR, 1)
    beta = gb_ref[:, 1:2]                                  # (TR, 1)
    scale = (1.0 + gamma) * inv_std

    o_ref[...] = (xc * scale + beta).astype(o_ref.dtype)


def _pick_row_tile(R, T, itemsize, budget_bytes):
    """Largest row tile (multiple of 8, <=1024) whose double-buffered in/out
    slabs plus the in-kernel f32 temporaries fit under `budget_bytes`, while
    keeping >=2 grid steps when there is more than one tile's worth of rows
    (so v7x megacore gets both TensorCores busy)."""
    # 2x input + 2x output buffers (native dtype) + two f32 tile-sized temps.
    bytes_per_row = T * (4 * itemsize + 2 * 4)
    max_rows = max(8, (budget_bytes // max(bytes_per_row, 1)) // 8 * 8)
    tr = int(min(1024, max_rows))
    if R > 8 and tr >= R:
        # Shrink to get at least 2 grid steps (still >= ceil(R/2) rows/step).
        tr = max(8, ((-(-R // 2)) + 7) // 8 * 8)
    return tr


def adain_pallas(x, c, w, b):
    """x: (B, C, T), c: (B, S), w: (2C, S), b: (2C,) -> (B, C, T)"""
    B, C, T = x.shape
    R = B * C

    # fc hoisted to plain XLA: h = c @ W^T + b, then gamma/beta interleaved
    # into a single (R, 2) parameter array (one small DMA per grid step).
    h = (c.astype(jnp.float32) @ w.astype(jnp.float32).T
         + b.astype(jnp.float32))                          # (B, 2C)
    gamma = h[:, :C]                                       # (B, C)
    beta = h[:, C:]                                        # (B, C)
    gb = jnp.stack([gamma, beta], axis=-1).reshape(R, 2)   # (R, 2)

    x_rows = x.reshape(R, T)                               # fused batch*channel rows

    itemsize = jnp.dtype(x.dtype).itemsize

    # Generation-aware VMEM budget (v7x has only 64 MiB physical per TC).
    try:
        vmem_cap = pltpu.get_tpu_info().vmem_capacity_bytes
    except Exception:
        vmem_cap = 64 << 20
    budget = min(24 << 20, vmem_cap // 2)
    vmem_limit = int(min(32 << 20, vmem_cap // 2 + (8 << 20)))

    TR = _pick_row_tile(R, T, itemsize, budget)
    grid = (pl.cdiv(R, TR),)                               # partial last block masked

    # Bandwidth-bound custom call: hint the XLA scheduler.
    cost = pl.CostEstimate(
        flops=7 * R * T,
        transcendentals=R,
        bytes_accessed=2 * R * T * itemsize + R * 2 * 4,
    )

    gb_spec = pl.BlockSpec((TR, 2), lambda i: (i, 0))
    slab_spec = pl.BlockSpec((TR, T), lambda i: (i, 0))

    out_rows = pl.pallas_call(
        adain_kernel,
        out_shape=jax.ShapeDtypeStruct((R, T), x.dtype),
        grid_spec=pltpu.PrefetchScalarGridSpec(
            num_scalar_prefetch=0,
            grid=grid,
            in_specs=[gb_spec, slab_spec],
            out_specs=slab_spec,
        ),
        compiler_params=pltpu.CompilerParams(
            dimension_semantics=("parallel",),
            vmem_limit_bytes=vmem_limit,
        ),
        cost_estimate=cost,
    )(gb, x_rows)

    return out_rows.reshape(B, C, T)


def adain_reference(x, c, w, b):
    """Pure-JAX reference mirroring the PyTorch forward."""
    h = c @ w.T + b                                  # (B, 2C)
    h = h[:, :, None]                                # (B, 2C, 1)
    u = jnp.mean(x, axis=2, keepdims=True)
    var = jnp.mean((x - u) * (x - u), axis=2, keepdims=True)
    std = jnp.sqrt(var + 1e-8)
    C = x.shape[1]
    gamma, beta = h[:, :C], h[:, C:]
    return (1.0 + gamma) * (x - u) / std + beta


if __name__ == "__main__":
    # Small shapes consistent with the module: x (B, dim_in, T), c (B, style_num)
    B, dim_in, T, style_num = 2, 8, 128, 16

    key = jax.random.PRNGKey(0)
    kx, kc, kw, kb = jax.random.split(key, 4)

    x = jax.random.normal(kx, (B, dim_in, T), dtype=jnp.float32)
    c = jax.random.normal(kc, (B, style_num), dtype=jnp.float32)

    # Deterministic nn.Linear(style_num, dim_in*2)-style init: U(-1/sqrt(fan_in), +1/sqrt(fan_in))
    bound = 1.0 / (style_num ** 0.5)
    w = jax.random.uniform(kw, (dim_in * 2, style_num), jnp.float32, -bound, bound)
    b = jax.random.uniform(kb, (dim_in * 2,), jnp.float32, -bound, bound)

    out = adain_pallas(x, c, w, b)
    out = jax.block_until_ready(out)

    ref = adain_reference(x, c, w, b)
    assert out.shape == (B, dim_in, T)
    assert jnp.allclose(out, ref, rtol=1e-4, atol=1e-4), "mismatch vs reference"

    print("KERNEL_OK")
</pallas_src>

<mosaic_0001>
module attributes {stable_mosaic.version = 11 : i64} {
  func.func @adain_kernel(%arg0: i32, %arg1: memref<8x2xf32, #tpu.memory_space<vmem>>, %arg2: memref<8x128xf32, #tpu.memory_space<vmem>>, %arg3: memref<8x128xf32, #tpu.memory_space<vmem>>) attributes {dimension_semantics = [#tpu.dimension_semantics<parallel>], iteration_bounds = array<i64: 2>, scalar_prefetch = 0 : i64, scratch_operands = 0 : i64, tpu.core_type = #tpu.core_type<tc>, window_params = [{transform_indices = @transform_0, window_bounds = array<i64: 8, 2>}, {transform_indices = @transform_1, window_bounds = array<i64: 8, 128>}, {transform_indices = @transform_2, window_bounds = array<i64: 8, 128>}]} {
    %c0 = arith.constant 0 : index
    %c0_0 = arith.constant 0 : index
    %0 = vector.load %arg2[%c0, %c0_0] : memref<8x128xf32, #tpu.memory_space<vmem>>, vector<8x128xf32>
    %cst = arith.constant dense<0.000000e+00> : vector<8xf32>
    %1 = vector.multi_reduction <add>, %0, %cst [1] : vector<8x128xf32> to vector<8xf32>
    %2 = vector.shape_cast %1 : vector<8xf32> to vector<8x1xf32>
    %cst_1 = arith.constant 7.812500e-03 : f32
    %3 = vector.broadcast %cst_1 : f32 to vector<8x1xf32>
    %4 = arith.mulf %2, %3 : vector<8x1xf32>
    %5 = vector.broadcast %4 : vector<8x1xf32> to vector<8x128xf32>
    %6 = arith.subf %0, %5 : vector<8x128xf32>
    %7 = arith.mulf %6, %6 : vector<8x128xf32>
    %cst_2 = arith.constant dense<0.000000e+00> : vector<8xf32>
    %8 = vector.multi_reduction <add>, %7, %cst_2 [1] : vector<8x128xf32> to vector<8xf32>
    %9 = vector.shape_cast %8 : vector<8xf32> to vector<8x1xf32>
    %cst_3 = arith.constant 7.812500e-03 : f32
    %10 = vector.broadcast %cst_3 : f32 to vector<8x1xf32>
    %11 = arith.mulf %9, %10 : vector<8x1xf32>
    %cst_4 = arith.constant 9.99999993E-9 : f32
    %12 = vector.broadcast %cst_4 : f32 to vector<8x1xf32>
    %13 = arith.addf %11, %12 : vector<8x1xf32>
    %14 = math.rsqrt %13 : vector<8x1xf32>
    %c0_5 = arith.constant 0 : index
    %c0_6 = arith.constant 0 : index
    %15 = vector.load %arg1[%c0_5, %c0_6] : memref<8x2xf32, #tpu.memory_space<vmem>>, vector<8x1xf32>
    %c0_7 = arith.constant 0 : index
    %c1 = arith.constant 1 : index
    %16 = vector.load %arg1[%c0_7, %c1] : memref<8x2xf32, #tpu.memory_space<vmem>>, vector<8x1xf32>
    %cst_8 = arith.constant 1.000000e+00 : f32
    %17 = vector.broadcast %cst_8 : f32 to vector<8x1xf32>
    %18 = arith.addf %17, %15 : vector<8x1xf32>
    %19 = arith.mulf %18, %14 : vector<8x1xf32>
    %20 = vector.broadcast %19 : vector<8x1xf32> to vector<8x128xf32>
    %21 = arith.mulf %6, %20 : vector<8x128xf32>
    %22 = vector.broadcast %16 : vector<8x1xf32> to vector<8x128xf32>
    %23 = arith.addf %21, %22 : vector<8x128xf32>
    %c0_9 = arith.constant 0 : index
    %c0_10 = arith.constant 0 : index
    %24 = vector.load %arg3[%c0_9, %c0_10] : memref<8x128xf32, #tpu.memory_space<vmem>>, vector<8x128xf32>
    tpu.vector_store %arg3[%c0_9, %c0_10], %23 {strides = array<i32>} : memref<8x128xf32, #tpu.memory_space<vmem>>, vector<8x128xf32>,
    return
  }
  func.func @transform_0(%arg0: i32) -> (i32, i32) {
    %c0_i32 = arith.constant 0 : i32
    %c0_i32_0 = arith.constant 0 : i32
    return %arg0, %c0_i32 : i32, i32
  }
  func.func @transform_1(%arg0: i32) -> (i32, i32) {
    %c0_i32 = arith.constant 0 : i32
    %c0_i32_0 = arith.constant 0 : i32
    return %arg0, %c0_i32 : i32, i32
  }
  func.func @transform_2(%arg0: i32) -> (i32, i32) {
    %c0_i32 = arith.constant 0 : i32
    %c0_i32_0 = arith.constant 0 : i32
    return %arg0, %c0_i32 : i32, i32
  }
}

</mosaic_0001>

<bundles_post_ra>
// kernel: tpu_custom_call.1
= control target key start
LH: loop header
LB: loop body
LE: loop exit
PB: predicated region body
PF: predicated region fallthrough
CT: control target
= control target key end

     0   :  { %7 = vsyncpa [#allocation3], 0  ;;  %s495_s0 = inlined_call_operand.vmem [shape: f32[16,2], index: 0, kind: input, shape index: {}]   ;;  %s496_s1 = inlined_call_operand.vmem [shape: f32[16,128], index: 1, kind: input, shape index: {}]   ;;  %s497_s2 = inlined_call_operand.hbm [shape: f32[16,128], index: 2, kind: output, shape index: {}]  }
   0x1   :  { %9 = vsyncpa [#allocation3 + $0x1], 0  ;;  %s405_s9 = smov 0   ;;  %s407_s10 = smov 0  }
   0x2   :  { %s409_s11 = smov 0   ;;  %s411_s12 = smov 0  }
   0x3 LB: > { %s426_s13 = sadd.s32 4294967295, %s385_s12   ;;  %s268_s14 = sadd.s32 4294967294, %s385_s12   ;;  %s385_s12 = sphi %s411_s12, %s503_s12   ;;  %s381_s11 = sphi %s409_s11, %s502_s11   ;;  %s377_s10 = sphi %s407_s10, %s501_s10   ;;  %s373_s9 = sphi %s405_s9, %s500_s9  }
   0x4   : > { %s430_s15 = sadd.s32 1, %s385_s12   ;;  %s74_s16 = sadd.s32 1, %s381_s11 }
   0x5   : > { %s71_s17 = ssub.s32 %s385_s12, %s430_s15  ;;  %p84_p0 = scmp.ne.s32.totalorder %s381_s11, %s377_s10 }
   0x6   : > { %p72_p1 = scmp.eq.s32.totalorder %s71_s17, 0  ;;  %p85_p2 = scmp.eq.s32.totalorder %s426_s13, 1 }
   0x7   : > { %p90_p3 = scmp.ne.s32.totalorder %s377_s10, %s373_s9  ;;  %p91_p4 = scmp.eq.s32.totalorder %s268_s14, 1 }
   0x8   : > { %s441_s18 = scalar_select %p72_p1, %s381_s11, %s74_s16  }
   0x9   : > { %p443_p5 = por %p85_p2, %p84_p0  ;;  %p447_p6 = por %p91_p4, %p90_p3 }
   0xa   : > { %p271_p7 = scmp.ge.s32.totalorder %s385_s12, 1  ;;  %p123_p8 = scmp.lt.s32.totalorder %s385_s12, 3 }
   0xc   : > { %p124_p9 = pnand %p271_p7, %p123_p8 }
   0xd   : > { %p148_p10 = scmp.lt.s32.totalorder (!%p124_p9), %s426_s13, 1  ;;  %s145_s29 = sand.u32 (!%p124_p9), 1, %s377_s10  }
   0xe   : > { %127 = sbr.rel (%p124_p9) target bundleno = 470 (0x1d6), region = 28  ;;  %s272_s30 = sshll.u32 (!%p124_p9), %s145_s29, 3 }
   0xf   : > { %s276_s3 = sshll.u32 (!%p124_p9), %s426_s13, 7  ;;  %s147_s4 = scalar_lea.vmem (!%p124_p9), [#allocation2], %s272_s30 }
  0x10   : > { %s197_s5 = sshll.u32 (!%p124_p9), %s147_s4, 4  ;;  %s195_s8 = scalar_lea.hbm (!%p124_p9), %s497_s2, %s276_s3  ;;  %s198_s5 = int_to_ptr.vmem [resolvable:$true] %s197_s5 }
  0x11   : > { %s184_s14 = scalar_lea.sflag (!%p124_p9), [#allocation3], %s145_s29  ;;  %s325_s16 = scalar_lea.vmem (!%p124_p9), %s198_s5, 128 }
  0x12   : > { %p326_p11 = scmp.ne.s32.totalorder (!%p124_p9), %s198_s5, %s325_s16  ;;  %s389_s17 = smov (!%p124_p9), [#allocation2]  }
  0x13   : > { %s149_s21 = scalar_select %p148_p10, %s426_s13, 1  ;;  %v387_v5 = vmov 0   ;;  %v388_v6 = vmov 1  }
  0x14   : > { %320 = vset.pattern.permute.xlu1 %v387_v5  ;;  %322 = vset.pattern.permute.xlu0 %v388_v6  ;;  %p327_p12 = pnand %p326_p11, %p443_p5 }
  0x15   : > { %s273_s22 = sshll.u32 %s149_s21, 3  ;;  %s329_s21 = sshll.u32 %s389_s17, 4  ;;  %s330_s21 = int_to_ptr.vmem [resolvable:$false] %s329_s21 }
  0x16   : > { %s155_s25 = scalar_lea.vmem %s496_s1, %s273_s22  ;;  %s151_s28 = scalar_lea.vmem %s495_s0, %s273_s22 }
  0x17   : > { %v156_v0 = vld [vmem:[%s155_s25] sm:$0xff]  ;;  %p328_p13 = pneg %p327_p12  ;;  %s331_s13 = scalar_lea.vmem %s330_s21, 256 }
  0x18   : > { %157 = vadd.xlane.f32.xlu0 %v156_v0  ;;  %v167_v10 = vld [vmem:[%s151_s28] sm:$0xff]  ;;  %p332_p0 = scmp.lt.s32.totalorder %s198_s5, %s330_s21  ;;  %p333_p1 = scmp.lt.s32.totalorder %s331_s13, %s325_s16 }
  0x19   : > { %v168_v11 = vadd.f32 1.0, %v167_v10 }
  0x1a   : > { %p334_p2 = por %p333_p1, %p332_p0 }
  0x1c   : > { %p335_p3 = pnand %p334_p2, %p328_p13 }
  0xa1   : > { %v158_v1 = vpop.xlane.xlu0 %157 }
  0xa2   : > { %v159_v2 = vmul.f32 0.0078125, %v158_v1 }
  0xa4   : > { %v160_v3 = vsub.f32 %v156_v0, %v159_v2 }
  0xa6   : > { %v161_v4 = vmul.f32 %v160_v3, %v160_v3 }
  0xa8   : > { %162 = vadd.xlane.f32.xlu0 %v161_v4 }
 0x131   : > { %v163_v7 = vpop.xlane.xlu0 %162 }
 0x132   : > { %v164_v8 = vmul.f32 0.0078125, %v163_v7 }
 0x134   : > { %v165_v9 = vadd.f32 1e-08, %v164_v8 }
 0x136   : > { %323 = vrsqrt.f32 %v165_v9 }
 0x143   : > { %v324_v12 = vpop.eup %323 }
 0x144   : > { %v169_v13 = vmul.f32 %v324_v12, %v168_v11 }
 0x146   : > { %172 = vperm.xlu1 %320, %v169_v13  }
 0x14a   : > { %321 = vset.pattern.permute.xlu1 %v388_v6 }
 0x14b   : > { %178 = vperm.xlu1 %321, %v167_v10  }
 0x1c1   : > { %v173_v14 = vpop.permute.xlu1 %172 }
 0x1c2   : > { %v175_v15 = vmul.f32 %v173_v14, %v160_v3 }
 0x1c6   : > { %v179_v16 = vpop.permute.xlu1 %178 }
 0x1c7   : > { %v181_v17 = vadd.f32 %v179_v16, %v175_v15 }
 0x1c9   : > { %182 = vst [vmem:[%s147_s4] sm:$0xff] %v181_v17 }
 0x1ca   : > { %338 = shalt.err (!%p335_p3)
}
 0x1cb   : > { %s339_s22 = scalar_lea.hbm %s195_s8, 128  ;;  %s343_s25 = scalar_lea.hbm %s497_s2, 256 }
 0x1cc   : > { %p340_p4 = scmp.ne.s32.totalorder %s195_s8, %s339_s22  ;;  %p344_p9 = scmp.lt.s32.totalorder %s195_s8, %s497_s2 }
 0x1cd   : > { %p345_p10 = scmp.lt.s32.totalorder %s343_s25, %s339_s22 }
 0x1ce   : > { %p341_p7 = pnand %p340_p4, %p443_p5 }
 0x1cf   : > { %p346_p11 = por %p345_p10, %p344_p9 }
 0x1d0   : > { %p342_p8 = pneg %p341_p7 }
 0x1d2   : > { %p347_p12 = pnand %p346_p11, %p342_p8 }
 0x1d4   : > { %350 = shalt.err (!%p347_p12)
}
 0x1d5   : > { %279 = dma.vmem_to_hbm [thread:$0]  (%p443_p5), %s198_s5, 128, %s195_s8, %s184_s14  }
 0x1d6 PF: > { %p285_p13 = scmp.ge.s32.totalorder %s385_s12, 2  ;;  %s209_s28 = sand.u32 1, %s373_s9  }
 0x1d7   : > { %s210_s29 = scalar_lea.sflag [#allocation3], %s209_s28 }
 0x1d8   : > { %p282_p0 = pnand %p285_p13, %p447_p6 }
 0x1da   : > { %p283_p1 = pneg %p282_p0 }
 0x1dc   : > { %368 = dma.done.wait (%p283_p1), %s210_s29, 128  }
 0x1dd   : > { %370 = vsyncadd (%p283_p1), %s210_s29, 4294967168  ;;  %p12_p2 = scmp.ge.s32.totalorder %s430_s15, 4   ;;  %s500_s9 = smov %s377_s10 }
 0x1de   : > { %s501_s10 = smov %s381_s11  ;;  %s502_s11 = smov %s441_s18 }
 0x1df   : > { %s503_s12 = smov %s430_s15  ;;  %14 = sbr.rel (!%p12_p2) target bundleno = 3 (0x3), region = 66 }
 0x1e4   :  { %215 = vsyncpa [#allocation3], 1 }
 0x1e5   :  { %217 = vsyncpa [#allocation3 + $0x1], 1 }

</bundles_post_ra>
